<compile_context>
chip_gen: v5e
topology: v5e:2x2
jax: 0.10.0
libtpu: 0.0.40
codegen_flags: <defaults>
</compile_context>

<pallas_src>
import jax
import jax.numpy as jnp
from jax.experimental import pallas as pl
from jax.experimental.pallas import tpu as pltpu


def _att_kernel(x_ref, w_ref, b_ref, u_ref, out_ref, alphas_ref):
    x = x_ref[...]                      # [Bt, T, H]
    w = w_ref[...]                      # [H, A]
    b = b_ref[...]                      # [1, A]
    u = u_ref[...]                      # [1, A]

    Bt, T, H = x.shape
    A = w.shape[1]

    # --- v = tanh(x @ W + b) on the MXU over flattened rows.
    # T is kept a multiple of 8 (sublane tile) so this reshape is a layout
    # no-op, not a VMEM relayout copy.
    x2 = x.reshape(Bt * T, H)
    v = jnp.tanh(jnp.dot(x2, w, preferred_element_type=jnp.float32) + b)  # [Bt*T, A]

    # --- attention logits: VPU multiply + cross-lane reduce (avoids an
    # [*,A]x[A,1] matmul that would use a single MXU output column).
    v3 = v.reshape(Bt, T, A)                                              # [Bt, T, A]
    vu = jnp.sum(v3 * u[None, :, :], axis=-1)                             # [Bt, T]

    # --- softmax over the time axis (dim=1 on the [B, T, 1] tensor).
    m = jnp.max(vu, axis=1, keepdims=True)
    e = jnp.exp(vu - m)
    alphas = e / jnp.sum(e, axis=1, keepdims=True)                        # [Bt, T]

    # --- weighted sum over T: VPU multiply + sublane reduce (avoids B
    # independent M=1 matvecs on the MXU).
    out = jnp.sum(x * alphas[:, :, None], axis=1)                         # [Bt, H]

    out_ref[...] = out.astype(out_ref.dtype)
    alphas_ref[...] = alphas.astype(alphas_ref.dtype)                     # lane-dense


def simple_att_layer(x, w_omega, b_omega, u_omega, block_b=None):
    """x: [B, T, H] float32. Returns (output [B, H], alphas [B, T, 1])."""
    B, T, H = x.shape
    A = w_omega.shape[1]

    if block_b is None:
        # Largest batch tile that keeps double-buffered x-tiles comfortably
        # inside the scoped VMEM limit on every generation (v7x has only
        # 64 MiB physical / 32 MiB scoped).  For the small test shapes this
        # is simply B.
        bytes_per_row = T * H * 4
        budget = 8 * 1024 * 1024            # per x tile (x2 for double buffer)
        block_b = max(1, min(B, budget // max(bytes_per_row, 1)))
    block_b = min(block_b, B)

    b_row = b_omega.reshape(1, A)
    u_row = u_omega.reshape(1, A)

    out_shapes = (
        jax.ShapeDtypeStruct((B, H), x.dtype),
        jax.ShapeDtypeStruct((B, T), x.dtype),   # lane-dense alphas
    )

    grid_spec = pl.GridSpec(
        grid=(pl.cdiv(B, block_b),),
        in_specs=[
            pl.BlockSpec((block_b, T, H), lambda i: (i, 0, 0)),
            pl.BlockSpec((H, A), lambda i: (0, 0)),   # resident weights
            pl.BlockSpec((1, A), lambda i: (0, 0)),
            pl.BlockSpec((1, A), lambda i: (0, 0)),
        ],
        out_specs=[
            pl.BlockSpec((block_b, H), lambda i: (i, 0)),
            pl.BlockSpec((block_b, T), lambda i: (i, 0)),
        ],
    )

    out, alphas2d = pl.pallas_call(
        _att_kernel,
        out_shape=out_shapes,
        grid_spec=grid_spec,
        compiler_params=pltpu.CompilerParams(
            # batch tiles are independent -> shard across TCs on v7x megacore
            dimension_semantics=("parallel",)),
    )(x, w_omega, b_row, u_row)

    # Reshape to PyTorch's (B, T, 1) alphas in the wrapper (layout plumbing).
    return out, alphas2d[..., None]


def _xavier_uniform(key, shape):
    fan_in, fan_out = shape[0], shape[1]
    bound = (6.0 / (fan_in + fan_out)) ** 0.5
    return jax.random.uniform(key, shape, jnp.float32, minval=-bound, maxval=bound)


def _reference(x, w, b, u):
    v = jnp.tanh(jnp.matmul(x, w) + b)              # [B, T, A]
    vu = jnp.matmul(v, u)                           # [B, T, 1]
    alphas = jax.nn.softmax(vu, axis=1)             # [B, T, 1]
    output = jnp.sum(x * alphas, axis=1)            # [B, H]
    return output, alphas


if __name__ == "__main__":
    B, T, H, A = 2, 8, 32, 16

    key = jax.random.PRNGKey(0)
    kx, kw, ku = jax.random.split(key, 3)

    x = jax.random.normal(kx, (B, T, H), jnp.float32)
    w_omega = _xavier_uniform(kw, (H, A))
    b_omega = jnp.zeros((A,), jnp.float32)
    u_omega = _xavier_uniform(ku, (A, 1))

    out, alphas = simple_att_layer(x, w_omega, b_omega, u_omega)
    out = jax.block_until_ready(out)
    alphas = jax.block_until_ready(alphas)

    ref_out, ref_alphas = _reference(x, w_omega, b_omega, u_omega)
    assert out.shape == (B, H) and alphas.shape == (B, T, 1)
    assert jnp.allclose(out, ref_out, atol=1e-5, rtol=1e-5)
    assert jnp.allclose(alphas, ref_alphas, atol=1e-5, rtol=1e-5)

    print("KERNEL_OK")
</pallas_src>

<mosaic_0001>
module attributes {stable_mosaic.version = 11 : i64} {
  func.func @_att_kernel(%arg0: i32, %arg1: memref<2x8x32xf32, #tpu.memory_space<vmem>>, %arg2: memref<32x16xf32, #tpu.memory_space<vmem>>, %arg3: memref<1x16xf32, #tpu.memory_space<vmem>>, %arg4: memref<1x16xf32, #tpu.memory_space<vmem>>, %arg5: memref<2x32xf32, #tpu.memory_space<vmem>>, %arg6: memref<2x8xf32, #tpu.memory_space<vmem>>) attributes {dimension_semantics = [#tpu.dimension_semantics<parallel>], iteration_bounds = array<i64: 1>, scalar_prefetch = 0 : i64, scratch_operands = 0 : i64, tpu.core_type = #tpu.core_type<tc>, window_params = [{transform_indices = @transform_0, window_bounds = array<i64: 2, 8, 32>}, {pipeline_mode = #tpu.pipeline_mode<synchronous>, transform_indices = @transform_1, window_bounds = array<i64: 32, 16>}, {pipeline_mode = #tpu.pipeline_mode<synchronous>, transform_indices = @transform_2, window_bounds = array<i64: 1, 16>}, {pipeline_mode = #tpu.pipeline_mode<synchronous>, transform_indices = @transform_3, window_bounds = array<i64: 1, 16>}, {transform_indices = @transform_4, window_bounds = array<i64: 2, 32>}, {transform_indices = @transform_5, window_bounds = array<i64: 2, 8>}]} {
    %c0 = arith.constant 0 : index
    %c0_0 = arith.constant 0 : index
    %c0_1 = arith.constant 0 : index
    %0 = vector.load %arg1[%c0, %c0_0, %c0_1] : memref<2x8x32xf32, #tpu.memory_space<vmem>>, vector<2x8x32xf32>
    %c0_2 = arith.constant 0 : index
    %c0_3 = arith.constant 0 : index
    %1 = vector.load %arg2[%c0_2, %c0_3] : memref<32x16xf32, #tpu.memory_space<vmem>>, vector<32x16xf32>
    %c0_4 = arith.constant 0 : index
    %c0_5 = arith.constant 0 : index
    %2 = vector.load %arg3[%c0_4, %c0_5] : memref<1x16xf32, #tpu.memory_space<vmem>>, vector<1x16xf32>
    %c0_6 = arith.constant 0 : index
    %c0_7 = arith.constant 0 : index
    %3 = vector.load %arg4[%c0_6, %c0_7] : memref<1x16xf32, #tpu.memory_space<vmem>>, vector<1x16xf32>
    %4 = vector.shape_cast %0 : vector<2x8x32xf32> to vector<16x32xf32>
    %cst = arith.constant dense<0.000000e+00> : vector<16x16xf32>
    %5 = tpu.matmul %4, %1, %cst {dimension_numbers = #tpu.dot_dimension_numbers<[1], [0], [0], [1], [0, 0, 1, 1], [], []>} : vector<16x32xf32>, vector<32x16xf32>, vector<16x16xf32> -> vector<16x16xf32>
    %6 = vector.broadcast %2 : vector<1x16xf32> to vector<16x16xf32>
    %7 = arith.addf %5, %6 : vector<16x16xf32>
    %8 = math.tanh %7 : vector<16x16xf32>
    %9 = vector.shape_cast %8 : vector<16x16xf32> to vector<2x8x16xf32>
    %10 = vector.shape_cast %3 : vector<1x16xf32> to vector<1x1x16xf32>
    %11 = vector.broadcast %10 : vector<1x1x16xf32> to vector<2x8x16xf32>
    %12 = arith.mulf %9, %11 : vector<2x8x16xf32>
    %cst_8 = arith.constant dense<0.000000e+00> : vector<2x8xf32>
    %13 = vector.multi_reduction <add>, %12, %cst_8 [2] : vector<2x8x16xf32> to vector<2x8xf32>
    %cst_9 = arith.constant dense<0xFF800000> : vector<2xf32>
    %14 = vector.multi_reduction <maximumf>, %13, %cst_9 [1] : vector<2x8xf32> to vector<2xf32>
    %15 = vector.shape_cast %14 : vector<2xf32> to vector<2x1xf32>
    %16 = vector.broadcast %15 : vector<2x1xf32> to vector<2x8xf32>
    %17 = arith.subf %13, %16 : vector<2x8xf32>
    %18 = math.exp %17 : vector<2x8xf32>
    %cst_10 = arith.constant dense<0.000000e+00> : vector<2xf32>
    %19 = vector.multi_reduction <add>, %18, %cst_10 [1] : vector<2x8xf32> to vector<2xf32>
    %20 = vector.shape_cast %19 : vector<2xf32> to vector<2x1xf32>
    %21 = vector.broadcast %20 : vector<2x1xf32> to vector<2x8xf32>
    %22 = arith.divf %18, %21 : vector<2x8xf32>
    %23 = vector.shape_cast %22 : vector<2x8xf32> to vector<2x8x1xf32>
    %24 = vector.broadcast %23 : vector<2x8x1xf32> to vector<2x8x32xf32>
    %25 = arith.mulf %0, %24 : vector<2x8x32xf32>
    %cst_11 = arith.constant dense<0.000000e+00> : vector<2x32xf32>
    %26 = vector.multi_reduction <add>, %25, %cst_11 [1] : vector<2x8x32xf32> to vector<2x32xf32>
    %c0_12 = arith.constant 0 : index
    %c0_13 = arith.constant 0 : index
    %27 = vector.load %arg5[%c0_12, %c0_13] : memref<2x32xf32, #tpu.memory_space<vmem>>, vector<2x32xf32>
    tpu.vector_store %arg5[%c0_12, %c0_13], %26 {strides = array<i32>} : memref<2x32xf32, #tpu.memory_space<vmem>>, vector<2x32xf32>,
    %c0_14 = arith.constant 0 : index
    %c0_15 = arith.constant 0 : index
    %28 = vector.load %arg6[%c0_14, %c0_15] : memref<2x8xf32, #tpu.memory_space<vmem>>, vector<2x8xf32>
    tpu.vector_store %arg6[%c0_14, %c0_15], %22 {strides = array<i32>} : memref<2x8xf32, #tpu.memory_space<vmem>>, vector<2x8xf32>,
    return
  }
  func.func @transform_0(%arg0: i32) -> (i32, i32, i32) {
    %c0_i32 = arith.constant 0 : i32
    %c0_i32_0 = arith.constant 0 : i32
    %c0_i32_1 = arith.constant 0 : i32
    return %arg0, %c0_i32, %c0_i32_0 : i32, i32, i32
  }
  func.func @transform_1(%arg0: i32) -> (i32, i32) {
    %c0_i32 = arith.constant 0 : i32
    %c0_i32_0 = arith.constant 0 : i32
    %c0_i32_1 = arith.constant 0 : i32
    return %c0_i32, %c0_i32_0 : i32, i32
  }
  func.func @transform_2(%arg0: i32) -> (i32, i32) {
    %c0_i32 = arith.constant 0 : i32
    %c0_i32_0 = arith.constant 0 : i32
    %c0_i32_1 = arith.constant 0 : i32
    return %c0_i32, %c0_i32_0 : i32, i32
  }
  func.func @transform_3(%arg0: i32) -> (i32, i32) {
    %c0_i32 = arith.constant 0 : i32
    %c0_i32_0 = arith.constant 0 : i32
    %c0_i32_1 = arith.constant 0 : i32
    return %c0_i32, %c0_i32_0 : i32, i32
  }
  func.func @transform_4(%arg0: i32) -> (i32, i32) {
    %c0_i32 = arith.constant 0 : i32
    %c0_i32_0 = arith.constant 0 : i32
    return %arg0, %c0_i32 : i32, i32
  }
  func.func @transform_5(%arg0: i32) -> (i32, i32) {
    %c0_i32 = arith.constant 0 : i32
    %c0_i32_0 = arith.constant 0 : i32
    return %arg0, %c0_i32 : i32, i32
  }
}

</mosaic_0001>

<bundles_post_ra>
// kernel: tpu_custom_call.1
= control target key start
LH: loop header
LB: loop body
LE: loop exit
PB: predicated region body
PF: predicated region fallthrough
CT: control target
= control target key end

     0   :  { %11 = vsyncpa [#allocation3], 0  ;;  %s387_s0 = inlined_call_operand.vmem [shape: f32[2,8,32], index: 0, kind: input, shape index: {}]   ;;  %s388_s1 = inlined_call_operand.vmem [shape: f32[32,16], index: 1, kind: input, shape index: {}]   ;;  %s389_s2 = inlined_call_operand.vmem [shape: f32[1,16], index: 2, kind: input, shape index: {}]   ;;  %s390_s3 = inlined_call_operand.vmem [shape: f32[1,16], index: 3, kind: input, shape index: {}]   ;;  %s391_s4 = inlined_call_operand.hbm [shape: f32[2,32], index: 4, kind: output, shape index: {0}]   ;;  %s392_s5 = inlined_call_operand.hbm [shape: f32[2,8], index: 5, kind: output, shape index: {1}]  }
   0x1   :  { %v26_v0 = vld [vmem:[%s388_s1 + $0x18] sm:$0xff]  ;;  %v25_v1 = vld [vmem:[%s388_s1 + $0x10] sm:$0xff]  ;;  %v24_v2 = vld [vmem:[%s388_s1 + $0x8] sm:$0xff] }
   0x2   :  { %51 = vmatpush.msra.mxu0 %v26_v0  ;;  %221 = vmatpush.msra.mxu1 %v26_v0 }
   0x4   :  { %52 = vmatpush.msra.mxu0 %v25_v1  ;;  %222 = vmatpush.msra.mxu1 %v25_v1 }
   0x5   :  { %12 = vsyncpa [#allocation5], 0  ;;  %v23_v3 = vld [vmem:[%s388_s1] sm:$0xff]  ;;  %vm32_vm0 = vcmask 261120   ;;  %v350_v5 = vld [vmem:[%s387_s0 + $0x8] sm:$0xff]  ;;  %vm69_vm1 = vcmask 130048   ;;  %v78_v19 = vlaneseq }
   0x6   :  { %53 = vmatpush.msra.mxu0 %v24_v2  ;;  %v345_v4 = vld [vmem:[%s387_s0] sm:$0xff]  ;;  %223 = vmatpush.msra.mxu1 %v24_v2  ;;  %vm82_vm2 = vcmask 1041409   ;;  %vm85_vm3 = vcmask 58368   ;;  %v297_v26 = vmov 0   ;;  %s205_s9 = sshll.u32 %s392_s5, 4  ;;  %s299_s5 = smov [#allocation2]   ;;  %s206_s9 = int_to_ptr.hbm [resolvable:$true] %s205_s9 }
   0x7   :  { %v231_v6 = vld [vmem:[%s389_s2] ss:$0 sm:$0xff]  ;;  %v362_v20 = vand.u32 127, %v78_v19  ;;  %229 = vset.pattern.permute.xlu2 %v297_v26  ;;  %228 = vset.pattern.permute.xlu1 %v297_v26  ;;  %s298_s2 = smov [#allocation4]   ;;  %s192_s10 = sshll.u32 %s299_s5, 4  ;;  %vm180_vm12 = vcmask 254976   ;;  %s193_s10 = int_to_ptr.vmem [resolvable:$true] %s192_s10 }
   0x8   :  { %54 = vmatpush.msra.mxu0 %v23_v3  ;;  %224 = vmatpush.msra.mxu1 %v23_v3  ;;  %v232_v11 = vld [vmem:[%s390_s3] ss:$0 sm:$0xff]  ;;  %s203_s3 = sshll.u32 %s298_s2, 4  ;;  %s194_s13 = sshll.u32 %s391_s4, 4  ;;  %s204_s3 = int_to_ptr.vmem [resolvable:$true] %s203_s3  ;;  %s195_s13 = int_to_ptr.hbm [resolvable:$true] %s194_s13 }
   0x9   :  { %219 = vmatmul.msk.f32.vlgmr.msra.gmra.mxu0 %vm32_vm0, %v345_v4  ;;  %220 = vmatmul.msk.f32.vlgmr.msra.gmra.mxu1 %vm32_vm0, %v350_v5 }
   0xa   :  { %230 = vset.pattern.permute.xlu0 %v297_v26 }
  0x86   :  { %v56_v7 = vpop.f32.mrf.mxu0  ;;  %v59_v8 = vpop.f32.mrf.mxu1 }
  0x87   :  { %v57_v9 = vadd.f32 %v231_v6, %v56_v7  ;;  %v60_v10 = vadd.f32 %v231_v6, %v59_v8 }
  0x89   :  { %233 = vtanh.f32 %v57_v9 }
  0x8a   :  { %235 = vtanh.f32 %v60_v10 }
  0x8f   :  { %v234_v12 = vpop.eup %233 }
  0x90   :  { %v67_v13 = vmul.f32 %v234_v12, %v232_v11  ;;  %v236_v14 = vpop.eup %235 }
  0x91   :  { %v68_v16 = vmul.f32 %v236_v14, %v232_v11 }
  0x92   :  { %v70_v15 = vsel %vm69_vm1, %v67_v13, 0.0 }
  0x93   :  { %71 = vadd.xlane.f32.xlu0 %v70_v15  ;;  %v73_v17 = vsel %vm69_vm1, %v68_v16, 0.0 }
  0x9b   :  { %74 = vadd.xlane.f32.xlu0 %v73_v17 }
 0x106   :  { %v72_v18 = vpop.xlane.xlu0 %71 }
 0x107   :  { %v80_v22 = vperm.slane %v72_v18, %v362_v20 }
 0x10e   :  { %v75_v21 = vpop.xlane.xlu0 %74 }
 0x10f   :  { %v81_v23 = vperm.slane %v75_v21, %v362_v20 }
 0x111   :  { %v83_v24 = vsel %vm82_vm2, %v81_v23, %v80_v22 }
 0x112   :  { %v86_v25 = vsel %vm85_vm3, %v83_v24, -inf }
 0x113   :  { %87 = vmax.xlane.f32.xlu1 %v86_v25 }
 0x186   :  { %v88_v27 = vpop.xlane.xlu1 %87 }
 0x187   :  { %v90_v28 = vperm.slane %v88_v27, 0  ;;  %v91_v29 = vperm.slane %v88_v27, 1 }
 0x189   :  { %v94_v30 = vsub.f32 %v72_v18, %v90_v28  ;;  %v95_v31 = vsub.f32 %v75_v21, %v91_v29 }
 0x18b   :  { %v96_v32 = vmul.f32 1.442695, %v94_v30  ;;  %v98_v33 = vmul.f32 1.442695, %v95_v31 }
 0x18d   :  { %237 = vpow2.f32 %v96_v32 }
 0x18e   :  { %239 = vpow2.f32 %v98_v33 }
 0x193   :  { %v238_v34 = vpop.eup %237 }
 0x194   :  { %v240_v35 = vpop.eup %239  ;;  %103 = vperm.xlu1 %228, %v238_v34  }
 0x195   :  { %106 = vperm.xlu2 %229, %v240_v35  }
 0x1ef   :  { %v107_v36 = vpop.permute.xlu2 %106 }
 0x1f0   :  { %v109_v38 = vperm.slane %v107_v36, %v362_v20 }
 0x206   :  { %v104_v37 = vpop.permute.xlu1 %103 }
 0x207   :  { %v108_v39 = vperm.slane %v104_v37, %v362_v20 }
 0x209   :  { %v110_v40 = vsel %vm82_vm2, %v109_v38, %v108_v39 }
 0x20a   :  { %v112_v41 = vsel %vm85_vm3, %v110_v40, 0.0 }
 0x20b   :  { %113 = vadd.xlane.f32.xlu2 %v112_v41 }
 0x27e   :  { %v114_v42 = vpop.xlane.xlu2 %113 }
 0x27f   :  { %v116_v43 = vperm.slane %v114_v42, 0  ;;  %v117_v44 = vperm.slane %v114_v42, 1 }
 0x281   :  { %241 = vrcp.f32 %v116_v43  ;;  %v131_v51 = vand.u32 2147483648, %v116_v43  ;;  %v146_v52 = vand.u32 2147483648, %v117_v44  ;;  %v129_v54 = vand.u32 2147483647, %v116_v43 }
 0x282   :  { %243 = vrcp.f32 %v117_v44  ;;  %v144_v56 = vand.u32 2147483647, %v117_v44  ;;  %vm125_vm6 = vweird.f32 %v116_v43  ;;  %vm140_vm7 = vweird.f32 %v117_v44 }
 0x283   :  { %v132_v59 = vor.u32 1.1754944e-38, %v131_v51  ;;  %v147_v60 = vor.u32 1.1754944e-38, %v146_v52  ;;  %vm130_vm10 = vcmp.eq.f32.partialorder %v129_v54, 8.507059e+37 }
 0x284   :  { %vm145_vm11 = vcmp.eq.f32.partialorder %v144_v56, 8.507059e+37 }
 0x287   :  { %v242_v45 = vpop.eup %241 }
 0x288   :  { %v244_v46 = vpop.eup %243  ;;  %v121_v47 = vmul.f32 %v242_v45, %v116_v43  ;;  %vm126_vm4 = vweird.f32 %v242_v45 }
 0x289   :  { %v136_v48 = vmul.f32 %v244_v46, %v117_v44  ;;  %vm141_vm5 = vweird.f32 %v244_v46  ;;  %vm127_vm8 = vmor %vm125_vm6, %vm126_vm4 }
 0x28a   :  { %v122_v49 = vsub.f32 1.0, %v121_v47  ;;  %vm142_vm9 = vmor %vm140_vm7, %vm141_vm5 }
 0x28b   :  { %v137_v50 = vsub.f32 1.0, %v136_v48 }
 0x28c   :  { %v123_v53 = vmul.f32 %v242_v45, %v122_v49 }
 0x28d   :  { %v138_v55 = vmul.f32 %v244_v46, %v137_v50 }
 0x28e   :  { %v124_v57 = vadd.f32 %v242_v45, %v123_v53 }
 0x28f   :  { %v139_v58 = vadd.f32 %v244_v46, %v138_v55 }
 0x290   :  { %v128_v61 = vsel %vm127_vm8, %v242_v45, %v124_v57 }
 0x291   :  { %v143_v62 = vsel %vm142_vm9, %v244_v46, %v139_v58  ;;  %v133_v63 = vsel %vm130_vm10, %v132_v59, %v128_v61 }
 0x292   :  { %v148_v0 = vsel %vm145_vm11, %v147_v60, %v143_v62  ;;  %v134_v1 = vmul.f32 %v238_v34, %v133_v63 }
 0x293   :  { %v149_v2 = vmul.f32 %v240_v35, %v148_v0 }
 0x294   :  { %152 = vperm.xlu0 %230, %v134_v1  }
 0x295   :  { %157 = vperm.xlu1 %228, %v149_v2  }
 0x306   :  { %v153_v3 = vpop.permute.xlu0 %152 }
 0x307   :  { %v158_v6 = vpop.permute.xlu1 %157  ;;  %v160_v7 = vmul.f32 %v153_v3, %v345_v4  ;;  %v182_v8 = vperm.slane %v153_v3, %v362_v20 }
 0x308   :  { %v161_v9 = vmul.f32 %v158_v6, %v350_v5  ;;  %v183_v10 = vperm.slane %v158_v6, %v362_v20 }
 0x309   :  { %v162_v11 = vsel %vm32_vm0, %v160_v7, 0.0 }
 0x30a   :  { %v169_v12 = vsel %vm32_vm0, %v161_v9, 0.0  ;;  %v163_v13 = vrot.slane %v162_v11, 4  ;;  %v184_v14 = vsel %vm82_vm2, %v183_v10, %v182_v8 }
 0x30b   :  { %v170_v15 = vrot.slane %v169_v12, 4  ;;  %186 = vst.msk [vmem:[#allocation4] sm:$0x3] %vm85_vm3, %v184_v14 }
 0x30c   :  { %v164_v16 = vadd.f32 %v163_v13, %v162_v11  ;;  %208 = dma.vmem_to_hbm [thread:$0]  %s204_s3, 32, %s206_s9, [#allocation5]  }
 0x30d   :  { %v171_v4 = vadd.f32 %v170_v15, %v169_v12 }
 0x30e   :  { %v165_v17 = vrot.slane %v164_v16, 2 }
 0x30f   :  { %v172_v18 = vrot.slane %v171_v4, 2 }
 0x310   :  { %v166_v5 = vadd.f32 %v165_v17, %v164_v16 }
 0x311   :  { %v173_v19 = vadd.f32 %v172_v18, %v171_v4 }
 0x312   :  { %v167_v20 = vrot.slane %v166_v5, 1 }
 0x313   :  { %v174_v21 = vrot.slane %v173_v19, 1 }
 0x314   :  { %v168_v22 = vadd.f32 %v167_v20, %v166_v5 }
 0x315   :  { %v175_v23 = vadd.f32 %v174_v21, %v173_v19 }
 0x317   :  { %v178_v24 = vsel %vm82_vm2, %v175_v23, %v168_v22 }
 0x318   :  { %181 = vst.msk [vmem:[#allocation2] sm:$0x3] %vm180_vm12, %v178_v24 }
 0x319   :  { %197 = dma.vmem_to_hbm [thread:$0]  %s193_s10, 32, %s195_s13, [#allocation3]  }
 0x31a   :  { %293 = dma.done.wait [#allocation3], 32  }
 0x31b   :  { %294 = vsyncadd [#allocation3], 4294967264 }
 0x31c   :  { %295 = dma.done.wait [#allocation5], 32  }
 0x31d   :  { %296 = vsyncadd [#allocation5], 4294967264 }
 0x31e   :  { %217 = vsyncpa [#allocation3], 1 }
 0x31f   :  { %218 = vsyncpa [#allocation5], 1 }

</bundles_post_ra>
